<compile_context>
chip_gen: v5e
topology: v5e:2x2
jax: 0.10.0
libtpu: 0.0.40
codegen_flags: <defaults>
</compile_context>

<pallas_src>
import jax
import jax.numpy as jnp
from jax.experimental import pallas as pl
from jax.experimental.pallas import tpu as pltpu

LANE = 128            # vreg lane width; last dim of the 2-D slab
ROW_ALIGN = 32        # tile_rows multiple: covers (8,128) f32 / (16,128) bf16 / (32,128) int8 packing
MIN_GRID_STEPS = 8    # keep >= 2 steps per v7x TensorCore + pipelining headroom
VMEM_BUDGET = 12 * 1024 * 1024   # double-buffered (in + f32 out); fits every default scoped-VMEM limit


def _to_float_kernel(x_ref, o_ref):
    # Pure elementwise cast on the VPU; the kernel is DMA/HBM-bound.
    o_ref[...] = x_ref[...].astype(jnp.float32)


def _cdiv(a, b):
    return -(-a // b)


def _round_up(a, m):
    return ((a + m - 1) // m) * m


def _cast_small(x2d):
    # Single full-extent block (last two dims equal the array dims -> always legal).
    return pl.pallas_call(
        _to_float_kernel,
        out_shape=jax.ShapeDtypeStruct(x2d.shape, jnp.float32),
    )(x2d)


def _cast_tiled(x2d, tile_rows, grid_steps):
    rows, cols = x2d.shape
    in_itemsize = x2d.dtype.itemsize
    # Double-buffered input block + double-buffered f32 output block.
    block_bytes = 2 * (in_itemsize + 4) * tile_rows * cols
    return pl.pallas_call(
        _to_float_kernel,
        out_shape=jax.ShapeDtypeStruct((rows, cols), jnp.float32),
        grid_spec=pltpu.PrefetchScalarGridSpec(
            num_scalar_prefetch=0,
            grid=(grid_steps,),
            in_specs=[pl.BlockSpec((tile_rows, cols), lambda i: (i, 0))],
            out_specs=pl.BlockSpec((tile_rows, cols), lambda i: (i, 0)),
        ),
        compiler_params=pltpu.CompilerParams(
            dimension_semantics=("parallel",),
            vmem_limit_bytes=int(max(block_bytes + (4 << 20), 16 << 20)),
        ),
    )(x2d)


def to_float(x):
    """Equivalent of torch's x.float(): cast any dtype to float32."""
    if x.dtype == jnp.float32:
        # torch's .float() returns the same tensor for float32 inputs.
        return x

    orig_shape = x.shape
    n = x.size
    if n == 0:
        return jnp.zeros(orig_shape, jnp.float32)

    flat = x.reshape(-1)
    n_main = (n // LANE) * LANE
    rem = n - n_main

    pieces = []

    if n_main > 0:
        rows = n_main // LANE
        x_main = flat[:n_main].reshape(rows, LANE)

        # Dtype- and buffer-aware tile cap.
        per_row_bytes = 2 * (x.dtype.itemsize + 4) * LANE
        tile_rows = max(ROW_ALIGN,
                        (VMEM_BUDGET // per_row_bytes) // ROW_ALIGN * ROW_ALIGN)

        # Don't let tiles grow so fat that the grid collapses (megacore / pipelining).
        if rows > ROW_ALIGN * MIN_GRID_STEPS:
            tile_rows = min(tile_rows,
                            _round_up(_cdiv(rows, MIN_GRID_STEPS), ROW_ALIGN))

        if rows <= tile_rows:
            # Small input: one full-extent block (rows need not be 8-aligned).
            out_main = _cast_small(x_main)
        else:
            grid_steps = _cdiv(rows, tile_rows)  # Pallas masks the partial edge block
            out_main = _cast_tiled(x_main, tile_rows, grid_steps)
        pieces.append(out_main.reshape(-1))

    if rem > 0:
        # < 128 trailing elements: tiny single-block kernel.
        x_rem = flat[n_main:].reshape(1, rem)
        pieces.append(_cast_small(x_rem).reshape(-1))

    out_flat = pieces[0] if len(pieces) == 1 else jnp.concatenate(pieces)
    return out_flat.reshape(orig_shape)


if __name__ == "__main__":
    key = jax.random.PRNGKey(0)
    B, C, H, W = 2, 4, 16, 16

    # bf16 NCHW input (128-aligned total size).
    x_bf16 = jax.random.normal(key, (B, C, H, W), dtype=jnp.bfloat16)
    y_bf16 = jax.block_until_ready(to_float(x_bf16))
    assert y_bf16.dtype == jnp.float32 and y_bf16.shape == (B, C, H, W)
    assert jnp.array_equal(y_bf16, x_bf16.astype(jnp.float32))

    # int32 input.
    x_int = jax.random.randint(jax.random.PRNGKey(1), (B, C, H, W), -100, 100,
                               dtype=jnp.int32)
    y_int = jax.block_until_ready(to_float(x_int))
    assert y_int.dtype == jnp.float32
    assert jnp.array_equal(y_int, x_int.astype(jnp.float32))

    # Non-128-aligned total size -> exercises the prefix + remainder split.
    x_odd = jax.random.normal(jax.random.PRNGKey(2), (2, 3, 5, 7), dtype=jnp.bfloat16)
    y_odd = jax.block_until_ready(to_float(x_odd))
    assert y_odd.dtype == jnp.float32 and y_odd.shape == (2, 3, 5, 7)
    assert jnp.array_equal(y_odd, x_odd.astype(jnp.float32))

    # Awkward row count -> multi-step grid with a partial edge block.
    x_big = jax.random.normal(jax.random.PRNGKey(3), (1, 1, 8232, 256), dtype=jnp.bfloat16)
    y_big = jax.block_until_ready(to_float(x_big))
    assert y_big.dtype == jnp.float32 and y_big.shape == x_big.shape
    assert jnp.array_equal(y_big, x_big.astype(jnp.float32))

    # float32 input short-circuits (no extra HBM round-trip).
    x_f32 = jax.random.normal(jax.random.PRNGKey(4), (B, C, H, W), dtype=jnp.float32)
    y_f32 = jax.block_until_ready(to_float(x_f32))
    assert y_f32.dtype == jnp.float32
    assert jnp.array_equal(y_f32, x_f32)

    print("KERNEL_OK")
</pallas_src>

<mosaic_0001>
module attributes {stable_mosaic.version = 11 : i64} {
  func.func @_to_float_kernel(%arg0: memref<16x128xbf16, #tpu.memory_space<vmem>>, %arg1: memref<16x128xf32, #tpu.memory_space<vmem>>) attributes {dimension_semantics = [], scalar_prefetch = 0 : i64, scratch_operands = 0 : i64, tpu.core_type = #tpu.core_type<tc>} {
    %c0 = arith.constant 0 : index
    %c0_0 = arith.constant 0 : index
    %0 = vector.load %arg0[%c0, %c0_0] : memref<16x128xbf16, #tpu.memory_space<vmem>>, vector<16x128xbf16>
    %1 = arith.extf %0 : vector<16x128xbf16> to vector<16x128xf32>
    %c0_1 = arith.constant 0 : index
    %c0_2 = arith.constant 0 : index
    %2 = vector.load %arg1[%c0_1, %c0_2] : memref<16x128xf32, #tpu.memory_space<vmem>>, vector<16x128xf32>
    tpu.vector_store %arg1[%c0_1, %c0_2], %1 {strides = array<i32>} : memref<16x128xf32, #tpu.memory_space<vmem>>, vector<16x128xf32>,
    return
  }
}

</mosaic_0001>

<bundles_post_ra>
// kernel: tpu_custom_call.1
= control target key start
LH: loop header
LB: loop body
LE: loop exit
PB: predicated region body
PF: predicated region fallthrough
CT: control target
= control target key end

     0   :  { %6 = vsyncpa [#allocation3], 0  ;;  %s134_s0 = inlined_call_operand.hbm [shape: bf16[16,128], index: 0, kind: input, shape index: {}]   ;;  %s135_s1 = inlined_call_operand.hbm [shape: f32[16,128], index: 1, kind: output, shape index: {}]  }
   0x1   :  { %7 = vsyncpa [#allocation4], 0  ;;  %s12_s8 = sshll.u32 %s134_s0, 4  ;;  %s112_s9 = smov [#allocation2]   ;;  %s13_s8 = int_to_ptr.hbm [resolvable:$true] %s12_s8 }
   0x2   :  { %s14_s10 = sshll.u32 %s112_s9, 4  ;;  %s113_s11 = smov 64   ;;  %s15_s10 = int_to_ptr.vmem [resolvable:$true] %s14_s10 }
   0x3   :  { %s114_s12 = smov 4  }
   0x4   :  { %20 = dma.hbm_to_vmem [thread:$0]  %s13_s8, 128, %s15_s10, [#allocation3], %s113_s11, %s113_s11, %s114_s12  }
   0x5   :  { %108 = dma.done.wait [#allocation3], 128  }
   0x6   :  { %109 = vsyncadd [#allocation3], 4294967168  ;;  %s115_s13 = smov [#allocation5]   ;;  %s37_s17 = sshll.u32 %s135_s1, 4  ;;  %v51_v0 = vld [vmem:[#allocation2] sm:$0xff]   ;;  %s38_s17 = int_to_ptr.hbm [resolvable:$true] %s37_s17 }
   0x7   :  { %s35_s14 = sshll.u32 %s115_s13, 4  ;;  %v52_v1 = vunpack.c.l.bf16 %v51_v0  ;;  %v53_v2 = vunpack.c.h.bf16 %v51_v0  ;;  %s116_s0 = smov 128   ;;  %s36_s14 = int_to_ptr.vmem [resolvable:$true] %s35_s14 }
   0x8   :  { %s117_s18 = smov 8  }
   0x9   :  { %29 = vst [vmem:[#allocation5] sm:$0xff] %v52_v1 }
   0xa   :  { %30 = vst [vmem:[#allocation5 + $0x8] sm:$0xff] %v53_v2 }
   0xb   :  { %43 = dma.vmem_to_hbm [thread:$0]  %s36_s14, 256, %s38_s17, [#allocation4], %s116_s0, %s116_s0, %s117_s18  }
   0xc   :  { %110 = dma.done.wait [#allocation4], 256  }
   0xd   :  { %111 = vsyncadd [#allocation4], 4294967040 }
   0xe   :  { %48 = vsyncpa [#allocation3], 1 }
   0xf   :  { %49 = vsyncpa [#allocation4], 1 }

</bundles_post_ra>
